<compile_context>
chip_gen: v6e
topology: v6e:2x2x1
jax: 0.10.0
libtpu: 0.0.40
codegen_flags: <defaults>
</compile_context>

<pallas_src>
import functools

import jax
import jax.numpy as jnp
from jax.experimental import pallas as pl
from jax.experimental.pallas import tpu as pltpu


# ----------------------------- in-kernel math ------------------------------

def _gelu_tanh(x):
    # tanh-approximate GELU: 0.5*x*(1+tanh(sqrt(2/pi)*(x+0.044715*x^3)))
    c = 0.7978845608028654
    return 0.5 * x * (1.0 + jnp.tanh(c * (x + 0.044715 * x * x * x)))


def _layer_norm(h, w, b, eps=1e-5):
    mu = jnp.mean(h, axis=-1, keepdims=True)
    var = jnp.mean(jnp.square(h - mu), axis=-1, keepdims=True)
    return (h - mu) * jax.lax.rsqrt(var + eps) * w + b


def _softmax(s):
    m = jnp.max(s, axis=-1, keepdims=True)
    p = jnp.exp(s - m)
    l = jnp.sum(p, axis=-1, keepdims=True)
    return p * pl.reciprocal(l, approx=True)   # EUP reciprocal, not a VALU divide


# ----------------------- prologue: hoisted K/V projections -------------------

def kv_projection_kernel(src_ref, lnw, lnb, wk, wv, k_out, v_out, *, apply_ln):
    h = src_ref[0].astype(jnp.float32)                     # (TS, Din)
    if apply_ln:
        h = _layer_norm(h, lnw[...], lnb[...])
    hb = h.astype(jnp.bfloat16)
    k_out[0] = jnp.dot(hb, wk[...],
                       preferred_element_type=jnp.float32).astype(jnp.bfloat16)
    v_out[0] = jnp.dot(hb, wv[...],
                       preferred_element_type=jnp.float32).astype(jnp.bfloat16)


def _project_kv(src, lnw, lnb, wk, wv, *, apply_ln):
    """K = (LN?)(src) @ wk, V = (LN?)(src) @ wv, computed once per batch."""
    B, S, Din = src.shape
    inner = wk.shape[1]
    s_tile = S
    for cand in (512, 256, 128, 64, 32, 16, 8):
        if cand <= S and S % cand == 0:
            s_tile = cand
            break
    n_st = S // s_tile

    kernel = functools.partial(kv_projection_kernel, apply_ln=apply_ln)
    return pl.pallas_call(
        kernel,
        out_shape=(jax.ShapeDtypeStruct((B, S, inner), jnp.bfloat16),
                   jax.ShapeDtypeStruct((B, S, inner), jnp.bfloat16)),
        grid_spec=pltpu.PrefetchScalarGridSpec(
            num_scalar_prefetch=0,
            grid=(B, n_st),
            in_specs=[pl.BlockSpec((1, s_tile, Din), lambda b, s: (b, s, 0)),
                      pl.BlockSpec((1, Din), lambda b, s: (0, 0)),
                      pl.BlockSpec((1, Din), lambda b, s: (0, 0)),
                      pl.BlockSpec((Din, inner), lambda b, s: (0, 0)),
                      pl.BlockSpec((Din, inner), lambda b, s: (0, 0))],
            out_specs=[pl.BlockSpec((1, s_tile, inner), lambda b, s: (b, s, 0)),
                       pl.BlockSpec((1, s_tile, inner), lambda b, s: (b, s, 0))],
        ),
        compiler_params=pltpu.CompilerParams(
            dimension_semantics=("parallel", "parallel")),
    )(src, lnw, lnb, wk, wv)


# ------------------------------- main kernel --------------------------------

def transformer_block_kernel(
    x_ref, k1_ref, v1_ref, k2_ref, v2_ref,
    ln1w, ln1b, ln2w, ln2b, ln3w, ln3b,
    wq1, wo1, bo1, wq2, wo2, bo2,
    wff_in, bff_in, wffo, bffo,
    o_ref, head_out_ref, *, num_heads, dim_head, scale):

    x_q = x_ref[0].astype(jnp.float32)                  # (TQ, D) query-tile rows only

    def attention(q_in, k_all, v_all, wq, wo, bo):
        # Fused full-width Q projection: bf16 MXU operands, f32 accumulation,
        # pre-scaled and cast to bf16 once.
        q_all = (jnp.dot(q_in.astype(jnp.bfloat16), wq[...],
                         preferred_element_type=jnp.float32) * scale
                 ).astype(jnp.bfloat16)                                   # (TQ, inner)
        # Per-head score / prob@V contractions (inherently K=dim_head); head
        # outputs go straight into a bf16 (TQ, inner) VMEM scratch at static
        # offsets so only one head's (TQ, S) f32 score/prob pair stays live.
        for h in range(num_heads):
            sl = slice(h * dim_head, (h + 1) * dim_head)
            s = jax.lax.dot_general(q_all[:, sl], k_all[:, sl],
                                    (((1,), (1,)), ((), ())),
                                    preferred_element_type=jnp.float32)   # (TQ, S)
            p = _softmax(s)
            head_out_ref[:, sl] = jnp.dot(
                p.astype(jnp.bfloat16), v_all[:, sl],
                preferred_element_type=jnp.float32).astype(jnp.bfloat16)
        # Output projection: ONE matmul over the concatenated heads.
        return jnp.dot(head_out_ref[...], wo[...],
                       preferred_element_type=jnp.float32) + bo[...]      # (TQ, D)

    # attn1: self-attention; K/V were projected from norm1(x) in the prologue.
    h1 = _layer_norm(x_q, ln1w[...], ln1b[...])
    x1 = attention(h1, k1_ref[0], v1_ref[0], wq1, wo1, bo1) + x_q

    # attn2: cross-attention; K/V were projected from the raw context.
    h2 = _layer_norm(x1, ln2w[...], ln2b[...])
    x2 = attention(h2, k2_ref[0], v2_ref[0], wq2, wo2, bo2) + x1

    # feed-forward (GEGLU): one in-projection, value * gelu(gate), out-projection
    h3 = _layer_norm(x2, ln3w[...], ln3b[...])
    dff = wffo.shape[0]
    ff_h = jnp.dot(h3.astype(jnp.bfloat16), wff_in[...],
                   preferred_element_type=jnp.float32) + bff_in[...]      # (TQ, 2*dff)
    val, gate = ff_h[:, :dff], ff_h[:, dff:]
    ff = jnp.dot((val * _gelu_tanh(gate)).astype(jnp.bfloat16), wffo[...],
                 preferred_element_type=jnp.float32) + bffo[...]
    o_ref[0] = (ff + x2).astype(o_ref.dtype)


# -------------------------------- wrapper -----------------------------------

PARAM_ORDER = (
    "ln1w", "ln1b", "ln2w", "ln2b", "ln3w", "ln3b",
    "wq1", "wo1", "bo1", "wq2", "wo2", "bo2",
    "wff_in", "bff_in", "wffo", "bffo",
)
MATMUL_WEIGHTS = frozenset(("wq1", "wo1", "wq2", "wo2", "wff_in", "wffo"))


def quant_basic_transformer_block(x, context, params, *, num_heads, dim_head,
                                  q_tile=None):
    B, N, D = x.shape
    _, M, Dc = context.shape
    inner = num_heads * dim_head
    dff = params["wffo"].shape[0]
    scale = dim_head ** -0.5
    f32, bf16 = jnp.float32, jnp.bfloat16

    # ---- hardware-aware VMEM budget / query-tile cap ------------------------
    try:
        vmem_cap = int(pltpu.get_tpu_info().vmem_capacity_bytes)
    except Exception:
        vmem_cap = 128 * 1024 * 1024
    if vmem_cap >= 100 * 1024 * 1024:        # v5e / v6e: 128 MiB physical VMEM
        q_cap, vmem_limit = 512, 100 * 1024 * 1024
    else:                                    # v7x: 64 MiB physical VMEM
        q_cap, vmem_limit = 256, min(48 * 1024 * 1024, vmem_cap)

    if q_tile is None:
        q_tile = N
        for cand in (512, 256, 128, 64, 32, 16, 8):
            if cand <= min(N, q_cap) and N % cand == 0:
                q_tile = cand
                break
        # keep >=2 grid steps so both v7x TensorCores get work even at B == 1
        if B == 1 and N // q_tile < 2 and N % 16 == 0:
            q_tile = N // 2
    assert N % q_tile == 0, "q_tile must divide the sequence length"
    n_qt = N // q_tile

    # ---- prologue: K/V projections hoisted out of the per-q-tile body -------
    ln1w, ln1b = params["ln1w"].astype(f32), params["ln1b"].astype(f32)
    k1, v1 = _project_kv(x, ln1w, ln1b,
                         params["wk1"].astype(bf16), params["wv1"].astype(bf16),
                         apply_ln=True)
    k2, v2 = _project_kv(context,
                         jnp.ones((1, Dc), f32), jnp.zeros((1, Dc), f32),
                         params["wk2"].astype(bf16), params["wv2"].astype(bf16),
                         apply_ln=False)

    # bf16 matmul weights for the MXU (halves weight DMA); LN params / biases f32.
    weight_list = [params[k].astype(bf16) if k in MATMUL_WEIGHTS
                   else params[k].astype(f32) for k in PARAM_ORDER]

    kernel = functools.partial(transformer_block_kernel, num_heads=num_heads,
                               dim_head=dim_head, scale=scale)

    # Advisory cost estimate (main kernel only) so XLA schedules neighbours well.
    macs = (N * D * inner + 2 * N * N * inner + N * inner * D          # attn1
            + N * D * inner + 2 * N * M * inner + N * inner * D        # attn2
            + N * D * (2 * dff) + N * dff * D)                         # GEGLU FF
    flops = 2 * B * macs
    transcendentals = B * (num_heads * N * (N + M) + N * dff)
    weight_bytes = sum(int(w.size) * w.dtype.itemsize for w in weight_list)
    kv_bytes = sum(int(t.size) * t.dtype.itemsize for t in (k1, v1, k2, v2))
    bytes_accessed = 2 * int(x.size) * x.dtype.itemsize + kv_bytes + weight_bytes
    cost = pl.CostEstimate(flops=int(flops), transcendentals=int(transcendentals),
                           bytes_accessed=int(bytes_accessed))

    def run(single_buffer):
        def maybe_buffered(shape, index_map, single):
            if single:
                return pl.BlockSpec(shape, index_map, pipeline_mode=pl.Buffered(1))
            return pl.BlockSpec(shape, index_map)

        def const_spec(shape):
            nd = len(shape)
            return maybe_buffered(shape, lambda b, q, _nd=nd: (0,) * _nd,
                                  single_buffer)

        def kv_spec(arr):
            _, s, _ = arr.shape
            # constant across the q axis; truly constant (single fetch) iff B == 1
            return maybe_buffered((1, s, inner), lambda b, q: (b, 0, 0),
                                  single_buffer and B == 1)

        in_specs = ([pl.BlockSpec((1, q_tile, D), lambda b, q: (b, q, 0))]
                    + [kv_spec(t) for t in (k1, v1, k2, v2)]
                    + [const_spec(w.shape) for w in weight_list])
        out_specs = pl.BlockSpec((1, q_tile, D), lambda b, q: (b, q, 0))

        return pl.pallas_call(
            kernel,
            out_shape=jax.ShapeDtypeStruct((B, N, D), x.dtype),
            grid_spec=pltpu.PrefetchScalarGridSpec(
                num_scalar_prefetch=0,
                grid=(B, n_qt),
                in_specs=in_specs,
                out_specs=out_specs,
                scratch_shapes=[pltpu.VMEM((q_tile, inner), bf16)],
            ),
            compiler_params=pltpu.CompilerParams(
                dimension_semantics=("parallel", "parallel"),
                vmem_limit_bytes=vmem_limit,
            ),
            cost_estimate=cost,
        )(x, k1, v1, k2, v2, *weight_list)

    if hasattr(pl, "Buffered"):
        try:
            out = run(True)
            jax.block_until_ready(out)   # surface any lowering/runtime issue here
            return out
        except Exception:
            pass  # fall back to default double buffering
    return run(False)


# ------------------------- deterministic parameters --------------------------

def init_params(key, dim, context_dim, num_heads, dim_head, ff_mult=4):
    inner = num_heads * dim_head
    dff = dim * ff_mult
    ks = jax.random.split(key, 14)

    def w(k, shape, s=0.02):
        return jax.random.normal(k, shape, jnp.float32) * s

    ones = jnp.ones((1, dim), jnp.float32)
    zeros = jnp.zeros((1, dim), jnp.float32)
    return dict(
        ln1w=ones, ln1b=zeros, ln2w=ones, ln2b=zeros, ln3w=ones, ln3b=zeros,
        # attn1 (self): to_q/to_k/to_v bias-free, to_out has bias
        wq1=w(ks[0], (dim, inner)), wk1=w(ks[1], (dim, inner)),
        wv1=w(ks[2], (dim, inner)),
        wo1=w(ks[3], (inner, dim)), bo1=w(ks[4], (1, dim), 0.01),
        # attn2 (cross): k/v project from the context dim
        wq2=w(ks[5], (dim, inner)), wk2=w(ks[6], (context_dim, inner)),
        wv2=w(ks[7], (context_dim, inner)),
        wo2=w(ks[8], (inner, dim)), bo2=w(ks[9], (1, dim), 0.01),
        # GEGLU feed-forward: proj_in Linear(dim, 2*dff) kept as ONE weight
        wff_in=w(ks[10], (dim, 2 * dff)), bff_in=w(ks[11], (1, 2 * dff), 0.01),
        wffo=w(ks[12], (dff, dim)), bffo=w(ks[13], (1, dim), 0.01),
    )


# ----------------------------- pure-JAX reference ----------------------------

def reference_block(x, context, params, *, num_heads, dim_head):
    def ln(h, w, b, eps=1e-5):
        mu = h.mean(-1, keepdims=True)
        var = ((h - mu) ** 2).mean(-1, keepdims=True)
        return (h - mu) * jax.lax.rsqrt(var + eps) * w + b

    def attn(q_in, kv_in, wq, wk, wv, wo, bo, scale):
        b, nq, _ = q_in.shape
        q, k, v = q_in @ wq, kv_in @ wk, kv_in @ wv

        def split(t):
            bb, n, _ = t.shape
            return t.reshape(bb, n, num_heads, dim_head).transpose(0, 2, 1, 3)

        qh, kh, vh = split(q), split(k), split(v)
        s = jnp.einsum('bhid,bhjd->bhij', qh, kh) * scale
        p = jax.nn.softmax(s, axis=-1)
        o = jnp.einsum('bhij,bhjd->bhid', p, vh)
        o = o.transpose(0, 2, 1, 3).reshape(b, nq, num_heads * dim_head)
        return o @ wo + bo

    scale = dim_head ** -0.5
    p = params
    h1 = ln(x, p["ln1w"], p["ln1b"])
    x = attn(h1, h1, p["wq1"], p["wk1"], p["wv1"], p["wo1"], p["bo1"], scale) + x
    h2 = ln(x, p["ln2w"], p["ln2b"])
    x = attn(h2, context, p["wq2"], p["wk2"], p["wv2"], p["wo2"], p["bo2"], scale) + x
    h3 = ln(x, p["ln3w"], p["ln3b"])
    ff_h = h3 @ p["wff_in"] + p["bff_in"]
    dff = p["wffo"].shape[0]
    val, gate = ff_h[..., :dff], ff_h[..., dff:]
    ff = (val * jax.nn.gelu(gate, approximate=False)) @ p["wffo"] + p["bffo"]
    return ff + x


if __name__ == "__main__":
    B, N, D = 2, 16, 32      # batch, sequence, model dim
    M, Dc = 8, 32            # context sequence, context dim
    H, DH = 4, 8             # heads, dim_head  (inner_dim = H*DH = D)

    key = jax.random.PRNGKey(0)
    kx, kc, kp = jax.random.split(key, 3)
    x = jax.random.normal(kx, (B, N, D), jnp.float32)
    context = jax.random.normal(kc, (B, M, Dc), jnp.float32)
    params = init_params(kp, D, Dc, H, DH)

    out = quant_basic_transformer_block(x, context, params,
                                        num_heads=H, dim_head=DH, q_tile=8)
    out = jax.block_until_ready(out)
    assert out.shape == (B, N, D) and out.dtype == jnp.float32

    # Loose numerical check against a pure-JAX f32 reference (the kernel uses
    # bf16 MXU operands, tanh-GELU and an approx reciprocal, so tolerance is
    # intentionally generous).
    ref = reference_block(x, context, params, num_heads=H, dim_head=DH)
    max_err = float(jnp.max(jnp.abs(out - ref)))
    assert max_err < 5e-2, f"kernel deviates from reference: {max_err}"
    print("KERNEL_OK")
</pallas_src>

<mosaic_0001>
module attributes {stable_mosaic.version = 11 : i64} {
  func.func @kv_projection_kernel(%arg0: i32, %arg1: i32, %arg2: memref<1x16x32xf32, #tpu.memory_space<vmem>>, %arg3: memref<1x32xf32, #tpu.memory_space<vmem>>, %arg4: memref<1x32xf32, #tpu.memory_space<vmem>>, %arg5: memref<32x32xbf16, #tpu.memory_space<vmem>>, %arg6: memref<32x32xbf16, #tpu.memory_space<vmem>>, %arg7: memref<1x16x32xbf16, #tpu.memory_space<vmem>>, %arg8: memref<1x16x32xbf16, #tpu.memory_space<vmem>>) attributes {dimension_semantics = [#tpu.dimension_semantics<parallel>, #tpu.dimension_semantics<parallel>], iteration_bounds = array<i64: 2, 1>, scalar_prefetch = 0 : i64, scratch_operands = 0 : i64, tpu.core_type = #tpu.core_type<tc>, window_params = [{transform_indices = @transform_0, window_bounds = array<i64: 1, 16, 32>}, {pipeline_mode = #tpu.pipeline_mode<synchronous>, transform_indices = @transform_1, window_bounds = array<i64: 1, 32>}, {pipeline_mode = #tpu.pipeline_mode<synchronous>, transform_indices = @transform_2, window_bounds = array<i64: 1, 32>}, {pipeline_mode = #tpu.pipeline_mode<synchronous>, transform_indices = @transform_3, window_bounds = array<i64: 32, 32>}, {pipeline_mode = #tpu.pipeline_mode<synchronous>, transform_indices = @transform_4, window_bounds = array<i64: 32, 32>}, {transform_indices = @transform_5, window_bounds = array<i64: 1, 16, 32>}, {transform_indices = @transform_6, window_bounds = array<i64: 1, 16, 32>}]} {
    %c0 = arith.constant 0 : index
    %c0_0 = arith.constant 0 : index
    %c0_1 = arith.constant 0 : index
    %0 = vector.load %arg2[%c0, %c0_0, %c0_1] : memref<1x16x32xf32, #tpu.memory_space<vmem>>, vector<1x16x32xf32>
    %1 = vector.shape_cast %0 : vector<1x16x32xf32> to vector<16x32xf32>
    %c0_2 = arith.constant 0 : index
    %c0_3 = arith.constant 0 : index
    %2 = vector.load %arg3[%c0_2, %c0_3] : memref<1x32xf32, #tpu.memory_space<vmem>>, vector<1x32xf32>
    %c0_4 = arith.constant 0 : index
    %c0_5 = arith.constant 0 : index
    %3 = vector.load %arg4[%c0_4, %c0_5] : memref<1x32xf32, #tpu.memory_space<vmem>>, vector<1x32xf32>
    %cst = arith.constant dense<0.000000e+00> : vector<16xf32>
    %4 = vector.multi_reduction <add>, %1, %cst [1] : vector<16x32xf32> to vector<16xf32>
    %5 = vector.shape_cast %4 : vector<16xf32> to vector<16x1xf32>
    %cst_6 = arith.constant 3.200000e+01 : f32
    %6 = vector.broadcast %cst_6 : f32 to vector<16x1xf32>
    %7 = arith.divf %5, %6 : vector<16x1xf32>
    %8 = vector.broadcast %7 : vector<16x1xf32> to vector<16x32xf32>
    %9 = arith.subf %1, %8 : vector<16x32xf32>
    %10 = arith.mulf %9, %9 : vector<16x32xf32>
    %cst_7 = arith.constant dense<0.000000e+00> : vector<16xf32>
    %11 = vector.multi_reduction <add>, %10, %cst_7 [1] : vector<16x32xf32> to vector<16xf32>
    %12 = vector.shape_cast %11 : vector<16xf32> to vector<16x1xf32>
    %cst_8 = arith.constant 3.200000e+01 : f32
    %13 = vector.broadcast %cst_8 : f32 to vector<16x1xf32>
    %14 = arith.divf %12, %13 : vector<16x1xf32>
    %15 = vector.broadcast %7 : vector<16x1xf32> to vector<16x32xf32>
    %16 = arith.subf %1, %15 : vector<16x32xf32>
    %cst_9 = arith.constant 9.99999974E-6 : f32
    %17 = vector.broadcast %cst_9 : f32 to vector<16x1xf32>
    %18 = arith.addf %14, %17 : vector<16x1xf32>
    %19 = math.rsqrt %18 : vector<16x1xf32>
    %20 = vector.broadcast %19 : vector<16x1xf32> to vector<16x32xf32>
    %21 = arith.mulf %16, %20 : vector<16x32xf32>
    %22 = vector.broadcast %2 : vector<1x32xf32> to vector<16x32xf32>
    %23 = arith.mulf %21, %22 : vector<16x32xf32>
    %24 = vector.broadcast %3 : vector<1x32xf32> to vector<16x32xf32>
    %25 = arith.addf %23, %24 : vector<16x32xf32>
    %26 = arith.truncf %25 : vector<16x32xf32> to vector<16x32xbf16>
    %c0_10 = arith.constant 0 : index
    %c0_11 = arith.constant 0 : index
    %27 = vector.load %arg5[%c0_10, %c0_11] : memref<32x32xbf16, #tpu.memory_space<vmem>>, vector<32x32xbf16>
    %cst_12 = arith.constant dense<0.000000e+00> : vector<16x32xf32>
    %28 = tpu.matmul %26, %27, %cst_12 {dimension_numbers = #tpu.dot_dimension_numbers<[1], [0], [0], [1], [0, 0, 1, 1], [], []>} : vector<16x32xbf16>, vector<32x32xbf16>, vector<16x32xf32> -> vector<16x32xf32>
    %29 = arith.truncf %28 : vector<16x32xf32> to vector<16x32xbf16>
    %c0_13 = arith.constant 0 : index
    %c0_14 = arith.constant 0 : index
    %c0_15 = arith.constant 0 : index
    %30 = vector.load %arg7[%c0_13, %c0_14, %c0_15] : memref<1x16x32xbf16, #tpu.memory_space<vmem>>, vector<1x16x32xbf16>
    %31 = vector.shape_cast %30 : vector<1x16x32xbf16> to vector<16x32xbf16>
    %32 = vector.shape_cast %29 : vector<16x32xbf16> to vector<1x16x32xbf16>
    tpu.vector_store %arg7[%c0_13, %c0_14, %c0_15], %32 {strides = array<i32>} : memref<1x16x32xbf16, #tpu.memory_space<vmem>>, vector<1x16x32xbf16>,
    %c0_16 = arith.constant 0 : index
    %c0_17 = arith.constant 0 : index
    %33 = vector.load %arg6[%c0_16, %c0_17] : memref<32x32xbf16, #tpu.memory_space<vmem>>, vector<32x32xbf16>
    %cst_18 = arith.constant dense<0.000000e+00> : vector<16x32xf32>
    %34 = tpu.matmul %26, %33, %cst_18 {dimension_numbers = #tpu.dot_dimension_numbers<[1], [0], [0], [1], [0, 0, 1, 1], [], []>} : vector<16x32xbf16>, vector<32x32xbf16>, vector<16x32xf32> -> vector<16x32xf32>
    %35 = arith.truncf %34 : vector<16x32xf32> to vector<16x32xbf16>
    %c0_19 = arith.constant 0 : index
    %c0_20 = arith.constant 0 : index
    %c0_21 = arith.constant 0 : index
    %36 = vector.load %arg8[%c0_19, %c0_20, %c0_21] : memref<1x16x32xbf16, #tpu.memory_space<vmem>>, vector<1x16x32xbf16>
    %37 = vector.shape_cast %36 : vector<1x16x32xbf16> to vector<16x32xbf16>
    %38 = vector.shape_cast %35 : vector<16x32xbf16> to vector<1x16x32xbf16>
    tpu.vector_store %arg8[%c0_19, %c0_20, %c0_21], %38 {strides = array<i32>} : memref<1x16x32xbf16, #tpu.memory_space<vmem>>, vector<1x16x32xbf16>,
    return
  }
  func.func @transform_0(%arg0: i32, %arg1: i32) -> (i32, i32, i32) {
    %c0_i32 = arith.constant 0 : i32
    %c0_i32_0 = arith.constant 0 : i32
    return %arg0, %arg1, %c0_i32 : i32, i32, i32
  }
  func.func @transform_1(%arg0: i32, %arg1: i32) -> (i32, i32) {
    %c0_i32 = arith.constant 0 : i32
    %c0_i32_0 = arith.constant 0 : i32
    %c0_i32_1 = arith.constant 0 : i32
    return %c0_i32, %c0_i32_0 : i32, i32
  }
  func.func @transform_2(%arg0: i32, %arg1: i32) -> (i32, i32) {
    %c0_i32 = arith.constant 0 : i32
    %c0_i32_0 = arith.constant 0 : i32
    %c0_i32_1 = arith.constant 0 : i32
    return %c0_i32, %c0_i32_0 : i32, i32
  }
  func.func @transform_3(%arg0: i32, %arg1: i32) -> (i32, i32) {
    %c0_i32 = arith.constant 0 : i32
    %c0_i32_0 = arith.constant 0 : i32
    %c0_i32_1 = arith.constant 0 : i32
    return %c0_i32, %c0_i32_0 : i32, i32
  }
  func.func @transform_4(%arg0: i32, %arg1: i32) -> (i32, i32) {
    %c0_i32 = arith.constant 0 : i32
    %c0_i32_0 = arith.constant 0 : i32
    %c0_i32_1 = arith.constant 0 : i32
    return %c0_i32, %c0_i32_0 : i32, i32
  }
  func.func @transform_5(%arg0: i32, %arg1: i32) -> (i32, i32, i32) {
    %c0_i32 = arith.constant 0 : i32
    %c0_i32_0 = arith.constant 0 : i32
    return %arg0, %arg1, %c0_i32 : i32, i32, i32
  }
  func.func @transform_6(%arg0: i32, %arg1: i32) -> (i32, i32, i32) {
    %c0_i32 = arith.constant 0 : i32
    %c0_i32_0 = arith.constant 0 : i32
    return %arg0, %arg1, %c0_i32 : i32, i32, i32
  }
}

</mosaic_0001>

<bundles_post_ra>
// kernel: tpu_custom_call.1
= control target key start
LH: loop header
LB: loop body
LE: loop exit
PB: predicated region body
PF: predicated region fallthrough
CT: control target
= control target key end

     0   :  { %s1352_s0 = inlined_call_operand.hbm [shape: f32[2,16,32], index: 0, kind: input, shape index: {}]   ;;  %s1353_s1 = inlined_call_operand.vmem [shape: f32[1,32], index: 1, kind: input, shape index: {}]   ;;  %s1354_s2 = inlined_call_operand.vmem [shape: f32[1,32], index: 2, kind: input, shape index: {}]   ;;  %s1355_s3 = inlined_call_operand.hbm [shape: bf16[32,32], index: 3, kind: input, shape index: {}]   ;;  %s1356_s4 = inlined_call_operand.hbm [shape: bf16[32,32], index: 4, kind: input, shape index: {}]   ;;  %s1357_s5 = inlined_call_operand.hbm [shape: bf16[2,16,32], index: 5, kind: output, shape index: {0}]   ;;  %s1358_s6 = inlined_call_operand.hbm [shape: bf16[2,16,32], index: 6, kind: output, shape index: {1}]  }
   0x1   :  { %1362 = sst [smem:[#allocation15_spill]] %s1355_s3 }
   0x2   :  { %1363 = sst [smem:[#allocation16_spill]] %s1356_s4 }
   0x3   :  { %12 = vsyncpa [#allocation3], 0 }
   0x4   :  { %14 = vsyncpa [#allocation3 + $0x1], 0 }
   0x5   :  { %15 = vsyncpa [#allocation6], 0 }
   0x6   :  { %16 = vsyncpa [#allocation4], 0 }
   0x7   :  { %18 = vsyncpa [#allocation4 + $0x1], 0 }
   0x8   :  { %19 = vsyncpa [#allocation10], 0 }
   0x9   :  { %21 = vsyncpa [#allocation10 + $0x1], 0  ;;  %s1113_s21 = smov 0   ;;  %s1115_s22 = smov 0  }
   0xa   :  { %s1117_s23 = smov 0   ;;  %s1119_s24 = smov 0  }
   0xb   :  { %s1121_s25 = smov 0   ;;  %s1123_s26 = smov 0  }
   0xc LB: > { %s701_s27 = sadd.s32 4294967295, %s1063_s26   ;;  %s702_s28 = sadd.s32 4294967294, %s1063_s26   ;;  %s1063_s26 = sphi %s1123_s26, %s27_s26   ;;  %s1059_s25 = sphi %s1121_s25, %s1382_s25   ;;  %s1055_s24 = sphi %s1119_s24, %s1381_s24   ;;  %s1051_s23 = sphi %s1117_s23, %s1380_s23   ;;  %s1047_s22 = sphi %s1115_s22, %s1379_s22   ;;  %s1043_s21 = sphi %s1113_s21, %s1378_s21  }
   0xd   : > { %p61_p0 = scmp.ne.s32.totalorder %s1047_s22, %s1043_s21  ;;  %p1147_p1 = scmp.eq.s32.totalorder %s701_s27, 0 }
   0xe   : > { %p1151_p2 = scmp.eq.s32.totalorder %s701_s27, 1  ;;  %p177_p3 = scmp.eq.s32.totalorder %s702_s28, 1 }
   0xf   : > { %s1364_s29 = scalar_select %p1147_p1, 1, 0 }
  0x10   : > { %p1157_p4 = por %p1147_p1, %p61_p0  ;;  %p703_p5 = scmp.ge.s32.totalorder %s1063_s26, 1 }
  0x11   : > { %p1162_p6 = por %p177_p3, %p61_p0  ;;  %p212_p7 = scmp.lt.s32.totalorder %s1063_s26, 3 }
  0x12   : > { %s1366_s7 = scalar_select %p1157_p4, 1, 0 }
  0x13   : > { %s1367_s8 = scalar_select %p1162_p6, 1, 0 }
  0x14   : > { %p1167_p8 = pnand %p703_p5, %p212_p7  ;;  %s1065_s10 = smov [#allocation5]  }
  0x15   : > { %s230_s11 = sshll.u32 %s1065_s10, 4  ;;  %s1066_s13 = smov [#allocation7]   ;;  %s231_s11 = int_to_ptr.vmem [resolvable:$true] %s230_s11 }
  0x16   : > { %p779_p9 = pneg %p1167_p8  ;;  %s243_s14 = sshll.u32 %s1066_s13, 4  ;;  %s244_s14 = int_to_ptr.vmem [resolvable:$true] %s243_s14 }
  0x17   : > { %s880_s15 = scalar_lea.vmem %s231_s11, 256  ;;  %p888_p5 = scmp.lt.s32.totalorder %s231_s11, %s231_s11 }
  0x18   : > { %p1176_p11 = pnand %p779_p9, %p1147_p1  ;;  %p881_p13 = scmp.ne.s32.totalorder %s231_s11, %s880_s15 }
  0x19   : > { %p889_p7 = scmp.lt.s32.totalorder %s880_s15, %s880_s15 }
  0x1a   : > { %p871_p12 = pneg %p1176_p11 }
  0x1b   : > { %p890_p10 = por %p889_p7, %p888_p5 }
  0x1c   : > { %p883_p0 = pnand %p881_p13, %p871_p12 }
  0x1e   : > { %p884_p3 = pneg %p883_p0 }
  0x20   : > { %p891_p9 = pnand %p890_p10, %p884_p3 }
  0x22   : > { %894 = shalt.err (!%p891_p9)
}
  0x23   : > { %s1067_s16 = smov 64   ;;  %s1068_s17 = smov 4  }
  0x24   : > { %s1370_s3 = sld [smem:[#allocation15_spill]]  ;;  %s906_s20 = scalar_lea.vmem %s244_s14, 256 }
  0x25   : > { %p907_p6 = scmp.ne.s32.totalorder %s244_s14, %s906_s20  ;;  %p914_p1 = scmp.lt.s32.totalorder %s244_s14, %s244_s14 }
  0x26   : > { %p915_p4 = scmp.lt.s32.totalorder %s906_s20, %s906_s20 }
  0x27   : > { %p909_p13 = pnand %p907_p6, %p871_p12 }
  0x28   : > { %p916_p5 = por %p915_p4, %p914_p1 }
  0x29   : > { %p910_p0 = pneg %p909_p13 }
  0x2a   : > { %782 = dma.hbm_to_vmem [thread:$0]  (!%p1176_p11), %s1370_s3, 256, %s231_s11, [#allocation6], %s1067_s16, %s1067_s16, %s1068_s17  }
  0x2b   : > { %p917_p10 = pnand %p916_p5, %p910_p0 }
  0x2d   : > { %920 = shalt.err (!%p917_p10)
}
  0x2e   : > { %s1371_s4 = sld [smem:[#allocation16_spill]]  ;;  %s39_s10 = sadd.s32 1, %s1059_s25 }
  0x2f   : > { %s48_s11 = sadd.s32 1, %s1051_s23  ;;  %p41_p1 = scmp.ge.s32.totalorder %s39_s10, 2 }
  0x30   : > { %p55_p4 = scmp.ne.s32.totalorder %s1051_s23, %s1047_s22  ;;  %p56_p6 = scmp.eq.s32.totalorder %s1063_s26, 0 }
  0x31   : > { %p799_p12 = scmp.lt.s32.totalorder %s1063_s26, 2  ;;  %s1384_s10 = smov (%p41_p1, %s39_s10), 0 }
  0x32   : > { %p57_p3 = por %p56_p6, %p55_p4  ;;  %p1208_p7 = por %p1151_p2, %p55_p4 }
  0x33   : > { %s43_s13 = ssub.s32 %s1059_s25, %s1384_s10  ;;  %s257_s15 = sand.u32 1, %s1051_s23  }
  0x34   : > { %785 = dma.hbm_to_vmem [thread:$0]  (!%p1176_p11), %s1371_s4, 256, %s244_s14, [#allocation6], %s1067_s16, %s1067_s16, %s1068_s17  }
  0x35   : > { %p46_p9 = scmp.eq.s32.totalorder %s43_s13, 0  ;;  %s707_s14 = sshll.u32 %s257_s15, 4 }
  0x36   : > { %s736_s16 = sshll.u32 %s1059_s25, 8  ;;  %s261_s27 = scalar_lea.vmem [#allocation2], %s707_s14 }
  0x37   : > { %s1217_s17 = scalar_select %p46_p9, %s1051_s23, %s48_s11  }
  0x38   : > { %s269_s20 = scalar_lea.hbm %s1352_s0, %s736_s16  ;;  %s270_s28 = sshll.u32 %s261_s27, 4  ;;  %s271_s28 = int_to_ptr.vmem [resolvable:$true] %s270_s28 }
  0x39   : > { %p1224_p11 = pnand %p799_p12, %p57_p3  ;;  %s258_s3 = scalar_lea.sflag [#allocation3], %s257_s15 }
  0x3a   : > { %s934_s13 = scalar_lea.vmem %s271_s28, 256  ;;  %s1069_s11 = smov [#allocation2]  }
  0x3b   : > { %p923_p2 = pneg %p1224_p11  ;;  %p935_p13 = scmp.ne.s32.totalorder %s271_s28, %s934_s13 }
  0x3c   : > { %s939_s4 = sshll.u32 %s1069_s11, 4  ;;  %s940_s4 = int_to_ptr.vmem [resolvable:$false] %s939_s4 }
  0x3d   : > { %p937_p0 = pnand %p935_p13, %p923_p2  ;;  %s941_s16 = scalar_lea.vmem %s940_s4, 512 }
  0x3e   : > { %p942_p10 = scmp.lt.s32.totalorder %s271_s28, %s940_s4  ;;  %p943_p1 = scmp.lt.s32.totalorder %s941_s16, %s934_s13 }
  0x3f   : > { %p938_p5 = pneg %p937_p0 }
  0x40   : > { %p944_p4 = por %p943_p1, %p942_p10 }
  0x42   : > { %p945_p6 = pnand %p944_p4, %p938_p5 }
  0x44   : > { %948 = shalt.err (!%p945_p6)
}
  0x45   : > { %s1070_s14 = smov 128   ;;  %s1071_s18 = smov 8  }
  0x46   : > { %789 = dma.hbm_to_vmem [thread:$0]  (!%p1224_p11), %s269_s20, 256, %s271_s28, %s258_s3, %s1070_s14, %s1070_s14, %s1071_s18  }
  0x47   : > { %282 = sbr.rel (%p1167_p8) target bundleno = 630 (0x276), region = 40  ;;  %s1235_s15 = sand.u32 (!%p1167_p8), 1, %s1047_s22  }
  0x48   : > { %s711_s19 = sshll.u32 (!%p1167_p8), %s1235_s15, 4  ;;  %s285_s4 = scalar_lea.sflag (!%p1167_p8), [#allocation3], %s1235_s15 }
  0x49   : > { %s288_s27 = scalar_lea.vmem (!%p1167_p8), [#allocation2], %s711_s19  ;;  %p1374_p12 = scmp.ne.s32.totalorder (!%p1167_p8), %s1366_s7, 0 }
  0x4c   : > { %1026 = dma.done.wait (%p1374_p12), %s285_s4, 256  }
  0x4d   : > { %1028 = vsyncadd (%p1374_p12), %s285_s4, 4294967040  ;;  %p1375_p3 = scmp.ne.s32.totalorder %s1364_s29, 0 }
  0x4f   : > { %1030 = dma.done.wait (%p1375_p3), [#allocation6], 512  }
  0x50   : > { %1032 = vsyncadd (%p1375_p3), [#allocation6], 4294966784  ;;  %vm338_vm0 = vcmask 261120   ;;  %v334_v0 = vld [vmem:[%s288_s27] sm:$0xff]  ;;  %v335_v1 = vld [vmem:[%s288_s27 + $0x8] sm:$0xff]  ;;  %v1072_v16 = vmov 0.0  }
  0x51   : > { %v339_v2 = vsel %vm338_vm0, %v334_v0, 0.0  ;;  %v342_v3 = vsel %vm338_vm0, %v335_v1, 0.0  ;;  %v861_v14 = vld [vmem:[#allocation5 + $0x8] sm:$0xff]   ;;  %v862_v15 = vld [vmem:[#allocation7 + $0x8] sm:$0xff]   ;;  %749 = vmatprep.subr.bf16.mxu0 %v1072_v16  ;;  %757 = vmatprep.subr.bf16.mxu1 %v1072_v16  ;;  %v863_v17 = vld [vmem:[#allocation5] sm:$0xff]   ;;  %vm1073_vm1 = vmmov 0  }
  0x52   : > { %340 = vadd.xlane.f32.xlu0 %v339_v2  ;;  %750 = vmatpush3.bf16.msra.mxu0 %v861_v14  ;;  %v864_v18 = vld [vmem:[#allocation7] sm:$0xff]   ;;  %v716_v27 = vld [vmem:[%s1353_s1] ss:$0 sm:$0xff]  ;;  %s714_s20 = sshll.u32 %s1235_s15, 3  ;;  %vm451_vm2 = vcmask 257024   ;;  %s741_s16 = sshll.u32 %s1055_s24, 7 }
  0x53   : > { %758 = vmatpush3.bf16.msra.mxu1 %v862_v15  ;;  %751 = vmatprep.subr.bf16.mxu0 %v1072_v16  ;;  %v717_v31 = vld [vmem:[%s1354_s2] ss:$0 sm:$0xff]  ;;  %s322_s28 = scalar_lea.vmem [#allocation8], %s714_s20  ;;  %s329_s13 = scalar_lea.vmem [#allocation9], %s714_s20 }
  0x54   : > { %759 = vmatprep.subr.bf16.mxu1 %v1072_v16  ;;  %753 = vmatprep.mubr.msk.bf16.mxu0 %vm1073_vm1, %v1072_v16  ;;  %s542_s30 = sshll.u32 %s322_s28, 4  ;;  %s560_s11 = sshll.u32 %s329_s13, 4  ;;  %s1262_s30 = int_to_ptr.vmem [resolvable:$true] %s542_s30  ;;  %s1265_s11 = int_to_ptr.vmem [resolvable:$true] %s560_s11 }
  0x55   : > { %761 = vmatprep.mubr.msk.bf16.mxu1 %vm1073_vm1, %v1072_v16  ;;  %s1270_s24 = scalar_lea.hbm %s1357_s5, %s741_s16  ;;  %s1275_s27 = scalar_lea.hbm %s1358_s6, %s741_s16 }
  0x56   : > { %343 = vadd.xlane.f32.xlu0 %v342_v3  ;;  %752 = vmatpush3.bf16.msra.mxu0 %v863_v17  ;;  %s522_s3 = scalar_lea.sflag [#allocation4], %s1235_s15  ;;  %s949_s29 = scalar_lea.vmem %s1262_s30, 128 }
  0x57   : > { %760 = vmatpush3.bf16.msra.mxu1 %v864_v18  ;;  %p950_p8 = scmp.ne.s32.totalorder %s1262_s30, %s949_s29  ;;  %s1074_s7 = smov [#allocation8]  }
  0x58   : > { %s953_s9 = sshll.u32 %s1074_s7, 4  ;;  %s954_s9 = int_to_ptr.vmem [resolvable:$false] %s953_s9 }
  0x59   : > { %p951_p9 = pnand %p950_p8, %p1208_p7  ;;  %s955_s20 = scalar_lea.vmem %s954_s9, 256 }
  0x5a   : > { %p956_p2 = scmp.lt.s32.totalorder %s1262_s30, %s954_s9  ;;  %p957_p13 = scmp.lt.s32.totalorder %s955_s20, %s949_s29 }
  0x5b   : > { %p952_p11 = pneg %p951_p9 }
  0x5c   : > { %p958_p0 = por %p957_p13, %p956_p2 }
  0x5e   : > { %p959_p5 = pnand %p958_p0, %p952_p11 }
  0xdb   : > { %v341_v4 = vpop.xlane.xlu0 %340 }
  0xdc   : > { %v346_v5 = vmul.f32 0.03125, %v341_v4 }
  0xde   : > { %v348_v6 = vsub.f32 %v334_v0, %v346_v5 }
  0xdf   : > { %v344_v7 = vpop.xlane.xlu0 %343 }
  0xe0   : > { %v347_v8 = vmul.f32 0.03125, %v344_v7  ;;  %v350_v9 = vmul.f32 %v348_v6, %v348_v6 }
  0xe2   : > { %v349_v10 = vsub.f32 %v335_v1, %v347_v8  ;;  %v352_v11 = vsel %vm338_vm0, %v350_v9, 0.0 }
  0xe3   : > { %353 = vadd.xlane.f32.xlu1 %v352_v11 }
  0xe4   : > { %v351_v12 = vmul.f32 %v349_v10, %v349_v10 }
  0xe6   : > { %v355_v13 = vsel %vm338_vm0, %v351_v12, 0.0 }
  0xe7   : > { %356 = vadd.xlane.f32.xlu1 %v355_v13 }
 0x16c   : > { %v354_v19 = vpop.xlane.xlu1 %353 }
 0x16d   : > { %v358_v20 = vmul.f32 0.03125, %v354_v19 }
 0x16f   : > { %v360_v21 = vadd.f32 1e-05, %v358_v20 }
 0x170   : > { %v357_v22 = vpop.xlane.xlu1 %356 }
 0x171   : > { %865 = vrsqrt.f32 %v360_v21  ;;  %v359_v23 = vmul.f32 0.03125, %v357_v22 }
 0x173   : > { %v361_v24 = vadd.f32 1e-05, %v359_v23 }
 0x175   : > { %867 = vrsqrt.f32 %v361_v24 }
 0x17e   : > { %v866_v25 = vpop.eup %865 }
 0x17f   : > { %v364_v26 = vmul.f32 %v866_v25, %v348_v6 }
 0x181   : > { %v372_v30 = vmul.f32 %v716_v27, %v364_v26 }
 0x182   : > { %v868_v28 = vpop.eup %867 }
 0x183   : > { %v365_v29 = vmul.f32 %v868_v28, %v349_v10  ;;  %v380_v33 = vadd.f32 %v717_v31, %v372_v30 }
 0x185   : > { %v373_v32 = vmul.f32 %v716_v27, %v365_v29 }
 0x187   : > { %v381_v34 = vadd.f32 %v717_v31, %v373_v32 }
 0x189   : > { %v382_v35 = vpack.c.bf16 %v381_v34, %v380_v33 }
 0x18b   : > { %754 = vmatmul.mubr.msk.bf16.vlgmr.msra.gmra.mxu0 %vm338_vm0, %v382_v35  ;;  %762 = vmatmul.mubr.msk.bf16.vlgmr.msra.gmra.mxu1 %vm338_vm0, %v382_v35 }
 0x24b   : > { %v436_v36 = vpop.f32.mrf.mxu0  ;;  %v504_v37 = vpop.f32.mrf.mxu1 }
 0x24c   : > { %v737_v38 = vpack.c.bf16 %v436_v36, %v436_v36  ;;  %v739_v39 = vpack.c.bf16 %v504_v37, %v504_v37 }
 0x24d   : > { %v755_v40 = vpop.f32.mrf.mxu0  ;;  %v763_v41 = vpop.f32.mrf.mxu1 }
 0x24e   : > { %452 = vst.msk [vmem:[%s322_s28] sm:$0xf] %vm451_vm2, %v737_v38  ;;  %519 = vst.msk [vmem:[%s329_s13] sm:$0xf] %vm451_vm2, %v739_v39 }
 0x24f   : > { %v439_v42 = vpop.f32.mrf.mxu0  ;;  %v507_v43 = vpop.f32.mrf.mxu1 }
 0x250   : > { %v738_v44 = vpack.c.bf16 %v439_v42, %v439_v42  ;;  %v740_v45 = vpack.c.bf16 %v507_v43, %v507_v43 }
 0x251   : > { %v756_v46 = vpop.f32.mrf.mxu0  ;;  %v764_v47 = vpop.f32.mrf.mxu1 }
 0x252   : > { %453 = vst.msk [vmem:[%s322_s28 + $0x4] sm:$0xf] %vm451_vm2, %v738_v44  ;;  %520 = vst.msk [vmem:[%s329_s13 + $0x4] sm:$0xf] %vm451_vm2, %v740_v45 }
 0x253   : > { %962 = shalt.err (!%p959_p5)
}
 0x254   : > { %s963_s28 = scalar_lea.hbm %s1270_s24, 128  ;;  %s967_s14 = scalar_lea.hbm %s1357_s5, 256 }
 0x255   : > { %p964_p10 = scmp.ne.s32.totalorder %s1270_s24, %s963_s28  ;;  %p968_p6 = scmp.lt.s32.totalorder %s1270_s24, %s1357_s5 }
 0x256   : > { %p969_p12 = scmp.lt.s32.totalorder %s967_s14, %s963_s28 }
 0x257   : > { %p965_p1 = pnand %p964_p10, %p1208_p7 }
 0x258   : > { %p970_p3 = por %p969_p12, %p968_p6 }
 0x259   : > { %p966_p4 = pneg %p965_p1 }
 0x25b   : > { %p971_p8 = pnand %p970_p3, %p966_p4 }
 0x25d   : > { %974 = shalt.err (!%p971_p8)
}
 0x25e   : > { %s1075_s4 = smov 64   ;;  %s1076_s29 = smov 4  }
 0x25f   : > { %775 = dma.vmem_to_hbm [thread:$0]  (%p1208_p7), %s1262_s30, 128, %s1270_s24, %s522_s3, %s1075_s4, %s1075_s4, %s1076_s29  }
 0x260   : > { %s527_s7 = scalar_lea.sflag [#allocation10], %s1235_s15  ;;  %s975_s9 = scalar_lea.vmem %s1265_s11, 128 }
 0x261   : > { %p976_p9 = scmp.ne.s32.totalorder %s1265_s11, %s975_s9  ;;  %s1077_s20 = smov [#allocation9]  }
 0x262   : > { %s979_s28 = sshll.u32 %s1077_s20, 4  ;;  %s980_s28 = int_to_ptr.vmem [resolvable:$false] %s979_s28 }
 0x263   : > { %p977_p11 = pnand %p976_p9, %p1208_p7  ;;  %s981_s13 = scalar_lea.vmem %s980_s28, 256 }
 0x264   : > { %p982_p13 = scmp.lt.s32.totalorder %s1265_s11, %s980_s28  ;;  %p983_p0 = scmp.lt.s32.totalorder %s981_s13, %s975_s9 }
 0x265   : > { %p978_p2 = pneg %p977_p11 }
 0x266   : > { %p984_p5 = por %p983_p0, %p982_p13 }
 0x268   : > { %p985_p10 = pnand %p984_p5, %p978_p2 }
 0x26a   : > { %988 = shalt.err (!%p985_p10)
}
 0x26b   : > { %s989_s30 = scalar_lea.hbm %s1275_s27, 128  ;;  %s993_s3 = scalar_lea.hbm %s1358_s6, 256 }
 0x26c   : > { %p990_p1 = scmp.ne.s32.totalorder %s1275_s27, %s989_s30  ;;  %p994_p12 = scmp.lt.s32.totalorder %s1275_s27, %s1358_s6 }
 0x26d   : > { %p995_p3 = scmp.lt.s32.totalorder %s993_s3, %s989_s30 }
 0x26e   : > { %p991_p4 = pnand %p990_p1, %p1208_p7 }
 0x26f   : > { %p996_p8 = por %p995_p3, %p994_p12 }
 0x270   : > { %p992_p6 = pneg %p991_p4 }
 0x272   : > { %p997_p9 = pnand %p996_p8, %p992_p6 }
 0x274   : > { %1000 = shalt.err (!%p997_p9)
}
 0x275   : > { %776 = dma.vmem_to_hbm [thread:$0]  (%p1208_p7), %s1265_s11, 128, %s1275_s27, %s527_s7, %s1075_s4, %s1075_s4, %s1076_s29  }
 0x276 PF: > { %s575_s18 = sand.u32 1, %s1043_s21   ;;  %p1376_p11 = scmp.ne.s32.totalorder %s1367_s8, 0 }
 0x277   : > { %p1377_p2 = scmp.ge.s32.totalorder %s1063_s26, 2  ;;  %s576_s19 = scalar_lea.sflag [#allocation4], %s575_s18 }
 0x279   : > { %p791_p13 = pnand %p1377_p2, %p1376_p11 }
 0x27b   : > { %p792_p0 = pneg %p791_p13 }
 0x27d   : > { %1034 = dma.done.wait (%p792_p0), %s576_s19, 128  }
 0x27e   : > { %1036 = vsyncadd (%p792_p0), %s576_s19, 4294967168  ;;  %s585_s9 = scalar_lea.sflag [#allocation10], %s575_s18 }
 0x27f   : > { %1038 = dma.done.wait (%p792_p0), %s585_s9, 128  }
 0x280   : > { %1040 = vsyncadd (%p792_p0), %s585_s9, 4294967168  ;;  %s27_s26 = sadd.s32 1, %s1063_s26   ;;  %s1378_s21 = smov %s1047_s22 }
 0x281   : > { %p24_p5 = scmp.ge.s32.totalorder %s27_s26, 4   ;;  %s1379_s22 = smov %s1051_s23 }
 0x282   : > { %s1380_s23 = smov %s1217_s17  ;;  %s1381_s24 = smov %s1059_s25 }
 0x283   : > { %s1382_s25 = smov %s1384_s10  ;;  %26 = sbr.rel (!%p24_p5) target bundleno = 12 (0xc), region = 110 }
 0x288   :  { %590 = vsyncpa [#allocation3], 1 }
 0x289   :  { %592 = vsyncpa [#allocation3 + $0x1], 1 }
 0x28a   :  { %593 = vsyncpa [#allocation6], 1 }
 0x28b   :  { %594 = vsyncpa [#allocation4], 1 }
 0x28c   :  { %596 = vsyncpa [#allocation4 + $0x1], 1 }
 0x28d   :  { %597 = vsyncpa [#allocation10], 1 }
 0x28e   :  { %599 = vsyncpa [#allocation10 + $0x1], 1 }

</bundles_post_ra>
